<compile_context>
chip_gen: v6e
topology: v6e:2x2x1
jax: 0.10.0
libtpu: 0.0.40
codegen_flags: <defaults>
</compile_context>

<pallas_src>
import math
import jax
import jax.numpy as jnp
from jax import lax
from jax.experimental import pallas as pl
from jax.experimental.pallas import tpu as pltpu  # noqa: F401  (TPU backend)

SEQ = 8
BATCH = 2
HIDDEN = 32
N_HEAD = 4
HEAD_DIM = HIDDEN // N_HEAD            # 8
NUM_HEADS_PER_KV = 2                   # GQA: 2 kv heads shared by 4 query heads
GROUP = N_HEAD // NUM_HEADS_PER_KV     # 2
ROT_DIM = HEAD_DIM // 2                # ChatGLM-style: rotate half of head dim
Q_DIM = N_HEAD * HEAD_DIM              # 32
KV_DIM = NUM_HEADS_PER_KV * HEAD_DIM   # 16
QKV_DIM = Q_DIM + 2 * KV_DIM           # 64
SCALE = 1.0 / math.sqrt(HEAD_DIM)


# ------------------------- fused Pallas kernel -------------------------

def fused_attn_kernel(x_ref, w2_ref, b2_ref, rotmul_ref, mask_ref, wd_ref,
                      out_ref, k_ref, v_ref):
    nrows = x_ref.shape[0]                             # R = SEQ * BATCH
    x = x_ref[...]                                     # (R, HIDDEN)

    # Fused [Q|K|V | swapped(Q|K|V)] projection: one lane-dense (R,128) matmul.
    proj = jnp.dot(x, w2_ref[...],
                   preferred_element_type=jnp.float32) + b2_ref[...]       # (R, 128)

    # Rotary: qkv = proj[:, :64]*cos + proj_swapped*sin_signed, with cos|sin
    # packed into one (R,128) multiplier (cos==1 / sin==0 at V & pass-through).
    t = proj * rotmul_ref[...]
    qkv = t[:, :QKV_DIM] + t[:, QKV_DIM:]                                   # (R, 64)

    # KV-cache outputs (post-rotary K, untouched V).
    k_ref[...] = qkv[:, Q_DIM:Q_DIM + KV_DIM].astype(k_ref.dtype)
    v_ref[...] = qkv[:, Q_DIM + KV_DIM:].astype(v_ref.dtype)

    # --- QK^T, GQA-grouped: the GROUP query heads sharing a KV head are
    # stacked along rows, so only NUM_HEADS_PER_KV matmul pushes are needed.
    s_parts = []
    for g in range(NUM_HEADS_PER_KV):
        h0 = g * GROUP
        q_g = jnp.concatenate(
            [qkv[:, (h0 + j) * HEAD_DIM:(h0 + j + 1) * HEAD_DIM]
             for j in range(GROUP)], axis=0)                                # (GROUP*R, D)
        k_g = qkv[:, Q_DIM + g * HEAD_DIM: Q_DIM + (g + 1) * HEAD_DIM]      # (R, D)
        s_parts.append(
            lax.dot_general(q_g, k_g, (((1,), (1,)), ((), ())),
                            preferred_element_type=jnp.float32))            # (GROUP*R, R)

    # Causal + same-batch mask as a precomputed additive bias; scale for Q is
    # already folded into W2, so no extra multiply here.
    s = jnp.concatenate(s_parts, axis=0) + mask_ref[...]                     # (N_HEAD*R, R)

    # --- softmax batched across ALL heads: one max/exp/sum/reciprocal pass.
    m = jnp.max(s, axis=-1, keepdims=True)
    p = jnp.exp(s - m)
    denom = jnp.sum(p, axis=-1, keepdims=True)
    probs = p * pl.reciprocal(denom, approx=True)

    # --- PV per KV group, then assemble a lane-contiguous (R, HIDDEN) context.
    ctx_parts = []
    for g in range(NUM_HEADS_PER_KV):
        p_g = probs[g * GROUP * nrows:(g + 1) * GROUP * nrows]               # (GROUP*R, R)
        v_g = qkv[:, Q_DIM + KV_DIM + g * HEAD_DIM:
                  Q_DIM + KV_DIM + (g + 1) * HEAD_DIM]                       # (R, D)
        ctx_g = jnp.dot(p_g, v_g, preferred_element_type=jnp.float32)        # (GROUP*R, D)
        for j in range(GROUP):
            ctx_parts.append(ctx_g[j * nrows:(j + 1) * nrows])               # head g*GROUP+j
    ctx = jnp.concatenate(ctx_parts, axis=-1)                                # (R, HIDDEN)

    # --- single fused output (dense) projection.
    out_ref[...] = jnp.dot(ctx, wd_ref[...],
                           preferred_element_type=jnp.float32).astype(out_ref.dtype)


# ------------------------- one-time parameter / table prep -------------------------

def _build_rot_multiplier(rope, seq_len, batch, dtype):
    """rope: (S, ROT_DIM//2, 2) of (cos, sin) -> (S*B, 2*QKV_DIM) combined multiplier."""
    rope = rope[:seq_len].astype(dtype)
    cos = rope[..., 0]                                   # (S, ROT_DIM//2)
    sin = rope[..., 1]
    cos_pair = jnp.repeat(cos, 2, axis=-1)               # (S, ROT_DIM)
    sin_pair = jnp.repeat(sin, 2, axis=-1)
    sign = jnp.tile(jnp.array([-1.0, 1.0], dtype), ROT_DIM // 2)
    pass_w = HEAD_DIM - ROT_DIM
    cos_head = jnp.concatenate([cos_pair, jnp.ones((seq_len, pass_w), dtype)], axis=-1)
    sin_head = jnp.concatenate([sin_pair * sign, jnp.zeros((seq_len, pass_w), dtype)], axis=-1)
    ones_head = jnp.ones((seq_len, HEAD_DIM), dtype)
    zeros_head = jnp.zeros((seq_len, HEAD_DIM), dtype)
    cos_full = jnp.concatenate([jnp.tile(cos_head, (1, N_HEAD)),
                                jnp.tile(cos_head, (1, NUM_HEADS_PER_KV)),
                                jnp.tile(ones_head, (1, NUM_HEADS_PER_KV))], axis=-1)
    sin_full = jnp.concatenate([jnp.tile(sin_head, (1, N_HEAD)),
                                jnp.tile(sin_head, (1, NUM_HEADS_PER_KV)),
                                jnp.tile(zeros_head, (1, NUM_HEADS_PER_KV))], axis=-1)
    rot = jnp.concatenate([cos_full, sin_full], axis=-1)                      # (S, 128)
    # rows are (s, b)-interleaved: row r = s*batch + b  ->  position s = r // batch
    return jnp.repeat(rot, batch, axis=0)                                     # (S*B, 128)


def prepare_attention(params, rotary_pos_emb, seq_len, batch, dtype=jnp.float32):
    """Hoisted out of the forward path: run once at parameter-load time."""
    # Fold 1/sqrt(head_dim) into the Q projection (rotary is linear -> commutes).
    wq = (params["wq"] * SCALE).astype(dtype)
    bq = (params["bq"] * SCALE).astype(dtype)
    wqkv = jnp.concatenate([wq, params["wk"], params["wv"]], axis=1)          # (H, 64)
    bqkv = jnp.concatenate([bq, params["bk"], params["bv"]])                  # (64,)
    swap = jnp.arange(QKV_DIM) ^ 1                                            # adjacent-pair swap
    w2 = jnp.concatenate([wqkv, wqkv[:, swap]], axis=1).astype(dtype)         # (H, 128)
    b2 = jnp.concatenate([bqkv, bqkv[swap]]).reshape(1, 2 * QKV_DIM).astype(dtype)

    rotmul = _build_rot_multiplier(rotary_pos_emb, seq_len, batch, dtype)     # (R, 128)

    # Same-batch causal mask as an additive bias, tiled for the head-stacked scores.
    R = seq_len * batch
    r = jnp.arange(R)
    allowed = ((r[:, None] % batch) == (r[None, :] % batch)) & \
              ((r[None, :] // batch) <= (r[:, None] // batch))
    mask = jnp.where(allowed, 0.0, -1e30).astype(dtype)                       # (R, R)
    mask = jnp.tile(mask, (N_HEAD, 1))                                        # (N_HEAD*R, R)

    return dict(w2=w2, b2=b2, rotmul=rotmul, mask=mask,
                wd=params["wd"].astype(dtype))


# ------------------------- forward wrapper -------------------------

def self_attention_forward(prep, hidden_states, kv_cache=None, use_cache=True):
    # TODO(synk): kv_cache concatenation and explicit attention_mask branches of
    # the PyTorch module are not fused here (this run uses the causal,
    # cache-less SDPA branch).
    assert kv_cache is None, "fused kernel implements the kv_cache=None path"

    seq_len, batch, hidden = hidden_states.shape
    dtype = hidden_states.dtype
    R = seq_len * batch

    # Free bitcast: row r = s*batch + b (no transpose kernels in the wrapper).
    x_flat = hidden_states.reshape(R, hidden)

    out_flat, k_flat, v_flat = pl.pallas_call(
        fused_attn_kernel,
        out_shape=(jax.ShapeDtypeStruct((R, hidden), dtype),
                   jax.ShapeDtypeStruct((R, KV_DIM), dtype),
                   jax.ShapeDtypeStruct((R, KV_DIM), dtype)),
    )(x_flat, prep["w2"], prep["b2"], prep["rotmul"], prep["mask"], prep["wd"])

    out = out_flat.reshape(seq_len, batch, hidden)                # free reshape
    new_kv_cache = None
    if use_cache:
        new_kv_cache = (
            k_flat.reshape(seq_len, batch, NUM_HEADS_PER_KV, HEAD_DIM),
            v_flat.reshape(seq_len, batch, NUM_HEADS_PER_KV, HEAD_DIM))
    return out, new_kv_cache


# ------------------------- pure-JAX reference (verification) -------------------------

def apply_rotary_pos_emb_ref(x, rope_cache):
    sq, b, n, hn = x.shape
    rot_dim = rope_cache.shape[-2] * 2
    x_rot, x_pass = x[..., :rot_dim], x[..., rot_dim:]
    xs = x_rot.reshape(sq, b, n, rot_dim // 2, 2)
    rope = rope_cache[:sq].reshape(sq, 1, 1, rot_dim // 2, 2)
    x0, x1 = xs[..., 0], xs[..., 1]
    r0, r1 = rope[..., 0], rope[..., 1]
    out = jnp.stack([x0 * r0 - x1 * r1, x1 * r0 + x0 * r1], axis=-1)
    return jnp.concatenate([out.reshape(sq, b, n, rot_dim), x_pass], axis=-1)


def ref_forward(params, hidden_states, rope):
    seq_len, batch, hidden = hidden_states.shape
    q = (hidden_states @ params["wq"] + params["bq"]).reshape(
        seq_len, batch, N_HEAD, HEAD_DIM)
    k = (hidden_states @ params["wk"] + params["bk"]).reshape(
        seq_len, batch, NUM_HEADS_PER_KV, HEAD_DIM)
    v = (hidden_states @ params["wv"] + params["bv"]).reshape(
        seq_len, batch, NUM_HEADS_PER_KV, HEAD_DIM)
    q = apply_rotary_pos_emb_ref(q, rope)
    k = apply_rotary_pos_emb_ref(k, rope)
    k_cache, v_cache = k, v
    kk = jnp.repeat(k, GROUP, axis=2)
    vv = jnp.repeat(v, GROUP, axis=2)
    qb, kb, vb = [jnp.transpose(t, (1, 2, 0, 3)) for t in (q, kk, vv)]
    s = jnp.einsum("bhqd,bhkd->bhqk", qb, kb) / math.sqrt(HEAD_DIM)
    mask = jnp.tril(jnp.ones((seq_len, seq_len), dtype=bool))
    s = jnp.where(mask[None, None], s, -jnp.inf)
    p = jax.nn.softmax(s, axis=-1)
    ctx = jnp.einsum("bhqk,bhkd->bhqd", p, vb)
    ctx = jnp.transpose(ctx, (2, 0, 1, 3)).reshape(seq_len, batch, hidden)
    return ctx @ params["wd"], k_cache, v_cache   # dense has bias=False


# ------------------------- main -------------------------

if __name__ == "__main__":
    key = jax.random.PRNGKey(0)
    ks = jax.random.split(key, 9)

    def init(k, shape):
        return (0.02 * jax.random.normal(k, shape)).astype(jnp.float32)

    params = {
        # weights stored pre-transposed as (in, out); nn.Linear does x @ W.T + b
        "wq": init(ks[0], (HIDDEN, HIDDEN)),
        "bq": init(ks[1], (HIDDEN,)),
        "wk": init(ks[2], (HIDDEN, KV_DIM)),
        "bk": init(ks[3], (KV_DIM,)),
        "wv": init(ks[4], (HIDDEN, KV_DIM)),
        "bv": init(ks[5], (KV_DIM,)),
        "wd": init(ks[6], (HIDDEN, HIDDEN)),   # dense has bias=False
    }

    hidden_states = jax.random.normal(ks[7], (SEQ, BATCH, HIDDEN), jnp.float32)

    # rotary cache: (seq, rot_dim//2, 2) with (cos, sin) pairs
    positions = jnp.arange(SEQ, dtype=jnp.float32)
    inv_freq = 1.0 / (10000.0 ** (jnp.arange(0, ROT_DIM, 2, dtype=jnp.float32) / ROT_DIM))
    angles = positions[:, None] * inv_freq[None, :]
    rope = jnp.stack([jnp.cos(angles), jnp.sin(angles)], axis=-1).astype(jnp.float32)

    # One-time prep (weight fusion, rotary tables, mask) — hoisted off the forward path.
    prep = prepare_attention(params, rope, SEQ, BATCH)

    out, kv_cache = self_attention_forward(prep, hidden_states,
                                           kv_cache=None, use_cache=True)
    out = jax.block_until_ready(out)

    ref_out, ref_k, ref_v = ref_forward(params, hidden_states, rope)
    assert out.shape == (SEQ, BATCH, HIDDEN)
    assert kv_cache[0].shape == (SEQ, BATCH, NUM_HEADS_PER_KV, HEAD_DIM)
    assert kv_cache[1].shape == (SEQ, BATCH, NUM_HEADS_PER_KV, HEAD_DIM)
    assert jnp.allclose(out, ref_out, atol=2e-3, rtol=2e-3), "output mismatch vs reference"
    assert jnp.allclose(kv_cache[0], ref_k, atol=2e-3, rtol=2e-3), "k cache mismatch"
    assert jnp.allclose(kv_cache[1], ref_v, atol=2e-3, rtol=2e-3), "v cache mismatch"

    print("KERNEL_OK")
</pallas_src>

<mosaic_0001>
module attributes {stable_mosaic.version = 11 : i64} {
  func.func @fused_attn_kernel(%arg0: memref<16x32xf32, #tpu.memory_space<vmem>>, %arg1: memref<32x128xf32, #tpu.memory_space<vmem>>, %arg2: memref<1x128xf32, #tpu.memory_space<vmem>>, %arg3: memref<16x128xf32, #tpu.memory_space<vmem>>, %arg4: memref<64x16xf32, #tpu.memory_space<vmem>>, %arg5: memref<32x32xf32, #tpu.memory_space<vmem>>, %arg6: memref<16x32xf32, #tpu.memory_space<vmem>>, %arg7: memref<16x16xf32, #tpu.memory_space<vmem>>, %arg8: memref<16x16xf32, #tpu.memory_space<vmem>>) attributes {dimension_semantics = [], scalar_prefetch = 0 : i64, scratch_operands = 0 : i64, tpu.core_type = #tpu.core_type<tc>} {
    %c0 = arith.constant 0 : index
    %c0_0 = arith.constant 0 : index
    %0 = vector.load %arg0[%c0, %c0_0] : memref<16x32xf32, #tpu.memory_space<vmem>>, vector<16x32xf32>
    %c0_1 = arith.constant 0 : index
    %c0_2 = arith.constant 0 : index
    %1 = vector.load %arg1[%c0_1, %c0_2] : memref<32x128xf32, #tpu.memory_space<vmem>>, vector<32x128xf32>
    %cst = arith.constant dense<0.000000e+00> : vector<16x128xf32>
    %2 = tpu.matmul %0, %1, %cst {dimension_numbers = #tpu.dot_dimension_numbers<[1], [0], [0], [1], [0, 0, 1, 1], [], []>} : vector<16x32xf32>, vector<32x128xf32>, vector<16x128xf32> -> vector<16x128xf32>
    %c0_3 = arith.constant 0 : index
    %c0_4 = arith.constant 0 : index
    %3 = vector.load %arg2[%c0_3, %c0_4] : memref<1x128xf32, #tpu.memory_space<vmem>>, vector<1x128xf32>
    %4 = vector.broadcast %3 : vector<1x128xf32> to vector<16x128xf32>
    %5 = arith.addf %2, %4 : vector<16x128xf32>
    %c0_5 = arith.constant 0 : index
    %c0_6 = arith.constant 0 : index
    %6 = vector.load %arg3[%c0_5, %c0_6] : memref<16x128xf32, #tpu.memory_space<vmem>>, vector<16x128xf32>
    %7 = arith.mulf %5, %6 : vector<16x128xf32>
    %8 = vector.extract_strided_slice %7 {offsets = [0, 0], sizes = [16, 64], strides = [1, 1]} : vector<16x128xf32> to vector<16x64xf32>
    %9 = vector.extract_strided_slice %7 {offsets = [0, 64], sizes = [16, 64], strides = [1, 1]} : vector<16x128xf32> to vector<16x64xf32>
    %10 = arith.addf %8, %9 : vector<16x64xf32>
    %11 = vector.extract_strided_slice %10 {offsets = [0, 32], sizes = [16, 16], strides = [1, 1]} : vector<16x64xf32> to vector<16x16xf32>
    %c0_7 = arith.constant 0 : index
    %c0_8 = arith.constant 0 : index
    %12 = vector.load %arg7[%c0_7, %c0_8] : memref<16x16xf32, #tpu.memory_space<vmem>>, vector<16x16xf32>
    tpu.vector_store %arg7[%c0_7, %c0_8], %11 {strides = array<i32>} : memref<16x16xf32, #tpu.memory_space<vmem>>, vector<16x16xf32>,
    %13 = vector.extract_strided_slice %10 {offsets = [0, 48], sizes = [16, 16], strides = [1, 1]} : vector<16x64xf32> to vector<16x16xf32>
    %c0_9 = arith.constant 0 : index
    %c0_10 = arith.constant 0 : index
    %14 = vector.load %arg8[%c0_9, %c0_10] : memref<16x16xf32, #tpu.memory_space<vmem>>, vector<16x16xf32>
    tpu.vector_store %arg8[%c0_9, %c0_10], %13 {strides = array<i32>} : memref<16x16xf32, #tpu.memory_space<vmem>>, vector<16x16xf32>,
    %15 = vector.extract_strided_slice %10 {offsets = [0, 0], sizes = [16, 8], strides = [1, 1]} : vector<16x64xf32> to vector<16x8xf32>
    %16 = vector.extract_strided_slice %10 {offsets = [0, 8], sizes = [16, 8], strides = [1, 1]} : vector<16x64xf32> to vector<16x8xf32>
    %17 = tpu.concatenate %15, %16 in 0 : vector<16x8xf32>, vector<16x8xf32> -> vector<32x8xf32>
    %18 = vector.extract_strided_slice %10 {offsets = [0, 32], sizes = [16, 8], strides = [1, 1]} : vector<16x64xf32> to vector<16x8xf32>
    %cst_11 = arith.constant dense<0.000000e+00> : vector<32x16xf32>
    %19 = tpu.matmul %17, %18, %cst_11 {dimension_numbers = #tpu.dot_dimension_numbers<[1], [1], [0], [0], [0, 0, 1, 0], [], []>} : vector<32x8xf32>, vector<16x8xf32>, vector<32x16xf32> -> vector<32x16xf32>
    %20 = vector.extract_strided_slice %10 {offsets = [0, 16], sizes = [16, 8], strides = [1, 1]} : vector<16x64xf32> to vector<16x8xf32>
    %21 = vector.extract_strided_slice %10 {offsets = [0, 24], sizes = [16, 8], strides = [1, 1]} : vector<16x64xf32> to vector<16x8xf32>
    %22 = tpu.concatenate %20, %21 in 0 : vector<16x8xf32>, vector<16x8xf32> -> vector<32x8xf32>
    %23 = vector.extract_strided_slice %10 {offsets = [0, 40], sizes = [16, 8], strides = [1, 1]} : vector<16x64xf32> to vector<16x8xf32>
    %cst_12 = arith.constant dense<0.000000e+00> : vector<32x16xf32>
    %24 = tpu.matmul %22, %23, %cst_12 {dimension_numbers = #tpu.dot_dimension_numbers<[1], [1], [0], [0], [0, 0, 1, 0], [], []>} : vector<32x8xf32>, vector<16x8xf32>, vector<32x16xf32> -> vector<32x16xf32>
    %25 = tpu.concatenate %19, %24 in 0 : vector<32x16xf32>, vector<32x16xf32> -> vector<64x16xf32>
    %c0_13 = arith.constant 0 : index
    %c0_14 = arith.constant 0 : index
    %26 = vector.load %arg4[%c0_13, %c0_14] : memref<64x16xf32, #tpu.memory_space<vmem>>, vector<64x16xf32>
    %27 = arith.addf %25, %26 : vector<64x16xf32>
    %cst_15 = arith.constant dense<0xFF800000> : vector<64xf32>
    %28 = vector.multi_reduction <maximumf>, %27, %cst_15 [1] : vector<64x16xf32> to vector<64xf32>
    %29 = vector.shape_cast %28 : vector<64xf32> to vector<64x1xf32>
    %30 = vector.broadcast %29 : vector<64x1xf32> to vector<64x16xf32>
    %31 = arith.subf %27, %30 : vector<64x16xf32>
    %32 = math.exp %31 : vector<64x16xf32>
    %cst_16 = arith.constant dense<0.000000e+00> : vector<64xf32>
    %33 = vector.multi_reduction <add>, %32, %cst_16 [1] : vector<64x16xf32> to vector<64xf32>
    %34 = vector.shape_cast %33 : vector<64xf32> to vector<64x1xf32>
    %35 = tpu.reciprocal %34 {approx = true} : vector<64x1xf32> -> vector<64x1xf32>
    %36 = vector.broadcast %35 : vector<64x1xf32> to vector<64x16xf32>
    %37 = arith.mulf %32, %36 : vector<64x16xf32>
    %38 = vector.extract_strided_slice %37 {offsets = [0, 0], sizes = [32, 16], strides = [1, 1]} : vector<64x16xf32> to vector<32x16xf32>
    %39 = vector.extract_strided_slice %10 {offsets = [0, 48], sizes = [16, 8], strides = [1, 1]} : vector<16x64xf32> to vector<16x8xf32>
    %cst_17 = arith.constant dense<0.000000e+00> : vector<32x8xf32>
    %40 = tpu.matmul %38, %39, %cst_17 {dimension_numbers = #tpu.dot_dimension_numbers<[1], [0], [0], [1], [0, 0, 1, 1], [], []>} : vector<32x16xf32>, vector<16x8xf32>, vector<32x8xf32> -> vector<32x8xf32>
    %41 = vector.extract_strided_slice %40 {offsets = [0, 0], sizes = [16, 8], strides = [1, 1]} : vector<32x8xf32> to vector<16x8xf32>
    %42 = vector.extract_strided_slice %40 {offsets = [16, 0], sizes = [16, 8], strides = [1, 1]} : vector<32x8xf32> to vector<16x8xf32>
    %43 = vector.extract_strided_slice %37 {offsets = [32, 0], sizes = [32, 16], strides = [1, 1]} : vector<64x16xf32> to vector<32x16xf32>
    %44 = vector.extract_strided_slice %10 {offsets = [0, 56], sizes = [16, 8], strides = [1, 1]} : vector<16x64xf32> to vector<16x8xf32>
    %cst_18 = arith.constant dense<0.000000e+00> : vector<32x8xf32>
    %45 = tpu.matmul %43, %44, %cst_18 {dimension_numbers = #tpu.dot_dimension_numbers<[1], [0], [0], [1], [0, 0, 1, 1], [], []>} : vector<32x16xf32>, vector<16x8xf32>, vector<32x8xf32> -> vector<32x8xf32>
    %46 = vector.extract_strided_slice %45 {offsets = [0, 0], sizes = [16, 8], strides = [1, 1]} : vector<32x8xf32> to vector<16x8xf32>
    %47 = vector.extract_strided_slice %45 {offsets = [16, 0], sizes = [16, 8], strides = [1, 1]} : vector<32x8xf32> to vector<16x8xf32>
    %48 = tpu.concatenate %41, %42, %46, %47 in 1 : vector<16x8xf32>, vector<16x8xf32>, vector<16x8xf32>, vector<16x8xf32> -> vector<16x32xf32>
    %c0_19 = arith.constant 0 : index
    %c0_20 = arith.constant 0 : index
    %49 = vector.load %arg5[%c0_19, %c0_20] : memref<32x32xf32, #tpu.memory_space<vmem>>, vector<32x32xf32>
    %cst_21 = arith.constant dense<0.000000e+00> : vector<16x32xf32>
    %50 = tpu.matmul %48, %49, %cst_21 {dimension_numbers = #tpu.dot_dimension_numbers<[1], [0], [0], [1], [0, 0, 1, 1], [], []>} : vector<16x32xf32>, vector<32x32xf32>, vector<16x32xf32> -> vector<16x32xf32>
    %c0_22 = arith.constant 0 : index
    %c0_23 = arith.constant 0 : index
    %51 = vector.load %arg6[%c0_22, %c0_23] : memref<16x32xf32, #tpu.memory_space<vmem>>, vector<16x32xf32>
    tpu.vector_store %arg6[%c0_22, %c0_23], %50 {strides = array<i32>} : memref<16x32xf32, #tpu.memory_space<vmem>>, vector<16x32xf32>,
    return
  }
}

</mosaic_0001>

<bundles_post_ra>
// kernel: tpu_custom_call.1
= control target key start
LH: loop header
LB: loop body
LE: loop exit
PB: predicated region body
PF: predicated region fallthrough
CT: control target
= control target key end

     0   :  { %14 = vsyncpa [#allocation3], 0  ;;  %s1340_s0 = inlined_call_operand.vmem [shape: f32[16,32], index: 0, kind: input, shape index: {}]   ;;  %s1341_s1 = inlined_call_operand.vmem [shape: f32[32,128], index: 1, kind: input, shape index: {}]   ;;  %s1342_s2 = inlined_call_operand.vmem [shape: f32[1,128], index: 2, kind: input, shape index: {}]   ;;  %s1343_s3 = inlined_call_operand.hbm [shape: f32[16,128], index: 3, kind: input, shape index: {}]   ;;  %s1344_s4 = inlined_call_operand.vmem [shape: f32[64,16], index: 4, kind: input, shape index: {}]   ;;  %s1345_s5 = inlined_call_operand.vmem [shape: f32[32,32], index: 5, kind: input, shape index: {}]   ;;  %s1346_s6 = inlined_call_operand.hbm [shape: f32[16,32], index: 6, kind: output, shape index: {0}]   ;;  %s1347_s7 = inlined_call_operand.hbm [shape: f32[16,16], index: 7, kind: output, shape index: {1}]   ;;  %s1348_s8 = inlined_call_operand.hbm [shape: f32[16,16], index: 8, kind: output, shape index: {2}]  }
   0x1   :  { %15 = vsyncpa [#allocation4], 0 }
   0x2   :  { %16 = vsyncpa [#allocation7], 0  ;;  %s1107_s27 = smov [#allocation2]  }
   0x3   :  { %s28_s28 = sshll.u32 %s1107_s27, 4  ;;  %s29_s28 = int_to_ptr.vmem [resolvable:$true] %s28_s28 }
   0x4   :  { %s1029_s29 = scalar_lea.vmem %s29_s28, 256  ;;  %p1034_p1 = scmp.lt.s32.totalorder %s29_s28, %s29_s28 }
   0x5   :  { %p1030_p0 = scmp.ne.s32.totalorder %s29_s28, %s1029_s29  ;;  %p1035_p2 = scmp.lt.s32.totalorder %s1029_s29, %s1029_s29 }
   0x7   :  { %p1036_p3 = por %p1035_p2, %p1034_p1 }
   0x9   :  { %p1037_p4 = pnand %p1036_p3, %p1030_p0 }
   0xb   :  { %1040 = shalt.err (!%p1037_p4)
}
   0xc   :  { %s1108_s30 = smov 128   ;;  %s1109_s9 = smov 8  }
   0xd   :  { %34 = dma.hbm_to_vmem [thread:$0]  %s1343_s3, 256, %s29_s28, [#allocation3], %s1108_s30, %s1108_s30, %s1109_s9  }
   0xe   :  { %1101 = dma.done.wait [#allocation3], 256  }
   0xf   :  { %1102 = vsyncadd [#allocation3], 4294967040  ;;  %vm55_vm0 = vcmask 261120   ;;  %v47_v0 = vld [vmem:[%s1341_s1 + $0x18] sm:$0xff]  ;;  %v46_v1 = vld [vmem:[%s1341_s1 + $0x10] sm:$0xff]  ;;  %vm174_vm1 = vcmask 64512  }
  0x10   :  { %912 = vmatprep.subr.mxu0 %v47_v0  ;;  %v42_v2 = vld [vmem:[%s1340_s0] sm:$0xff]  ;;  %v45_v3 = vld [vmem:[%s1341_s1 + $0x8] sm:$0xff]  ;;  %s1113_s25 = smov 88   ;;  %s1114_s26 = smov 112   ;;  %vm159_vm2 = vcmask 130048   ;;  %v383_v36 = vld [vmem:[%s1344_s4 + $0x10] sm:$0xff] }
  0x11   :  { %913 = vmatpush3.msra.mxu0 %v47_v0  ;;  %920 = vmatprep.mubr.msk.f32.mxu0 %vm55_vm0, %v42_v2  ;;  %v44_v4 = vld [vmem:[%s1341_s1] sm:$0xff]  ;;  %v43_v5 = vld [vmem:[%s1340_s0 + $0x8] sm:$0xff]  ;;  %s1110_s1 = smov 64   ;;  %s1111_s0 = smov 120   ;;  %v384_v49 = vld [vmem:[%s1344_s4 + $0x18] sm:$0xff]  ;;  %vm713_vm3 = vcmask 195584  }
  0x12   :  { %914 = vmatprep.subr.mxu0 %v46_v1  ;;  %v851_v7 = vld [vmem:[%s1342_s2] ss:$0 sm:$0xff]  ;;  %v138_v13 = vld [vmem:[#allocation2 + $0x8] sm:$0xff]  ;;  %s1112_s2 = smov 96   ;;  %v388_v53 = vld [vmem:[%s1344_s4 + $0x38] sm:$0xff]  ;;  %s1115_s22 = smov 80  }
  0x13   :  { %915 = vmatpush3.msra.mxu0 %v46_v1  ;;  %v137_v9 = vld [vmem:[#allocation2] sm:$0xff]  ;;  %v382_v29 = vld [vmem:[%s1344_s4 + $0x8] sm:$0xff]  ;;  %v387_v55 = vld [vmem:[%s1344_s4 + $0x30] sm:$0xff]  ;;  %s1117_s28 = smov 16   ;;  %s1118_s29 = smov 24  }
  0x14   :  { %916 = vmatprep.subr.mxu0 %v45_v3  ;;  %v386_v34 = vld [vmem:[%s1344_s4 + $0x28] sm:$0xff]  ;;  %v381_v37 = vld [vmem:[%s1344_s4] sm:$0xff] }
  0x15   :  { %917 = vmatpush3.msra.mxu0 %v45_v3  ;;  %v385_v45 = vld [vmem:[%s1344_s4 + $0x20] sm:$0xff]  ;;  %s1116_s4 = smov 72  }
  0x16   :  { %918 = vmatprep.subr.mxu0 %v44_v4 }
  0x17   :  { %919 = vmatpush3.msra.mxu0 %v44_v4 }
  0x18   :  { %921 = vmatmul.mubr.msk.f32.vlgmr.msra.gmra.mxu0 %vm55_vm0, %v43_v5 }
  0xd8   :  { %v922_v6 = vpop.f32.mrf.mxu0 }
  0xd9   :  { %v134_v11 = vadd.f32 %v922_v6, %v851_v7 }
  0xda   :  { %v128_v8 = vpop.f32.mrf.mxu0 }
  0xdb   :  { %v129_v10 = vadd.f32 %v851_v7, %v128_v8  ;;  %v140_v14 = vmul.f32 %v138_v13, %v134_v11 }
  0xdd   :  { %v139_v12 = vmul.f32 %v137_v9, %v129_v10 }
  0xdf   :  { %143 = vrot.lane.b32.xlu0 %v139_v12, %s1110_s1 }
  0xe3   :  { %145 = vrot.lane.b32.xlu0 %v140_v14, %s1110_s1 }
 0x151   :  { %v144_v15 = vpop.permute.xlu0 %143 }
 0x152   :  { %v1196_v16 = vadd.f32 %v144_v15, %v139_v12 }
 0x154   :  { %170 = vrot.lane.b32.xlu1 %v1196_v16, %s1111_s0  ;;  %927 = vmatprep.mubr.msk.f32.mxu1 %vm174_vm1, %v1196_v16 }
 0x155   :  { %v146_v17 = vpop.permute.xlu0 %145 }
 0x156   :  { %v1201_v18 = vadd.f32 %v146_v17, %v140_v14 }
 0x158   :  { %155 = vrot.lane.b32.xlu0 %v1201_v18, %s1112_s2  ;;  %172 = vrot.lane.b32.xlu1 %v1201_v18, %s1111_s0 }
 0x15c   :  { %153 = vrot.lane.b32.xlu0 %v1196_v16, %s1112_s2  ;;  %282 = vrot.lane.b32.xlu1 %v1201_v18, %s1113_s25 }
 0x160   :  { %272 = vrot.lane.b32.xlu0 %v1196_v16, %s1114_s26  ;;  %280 = vrot.lane.b32.xlu1 %v1196_v16, %s1113_s25 }
 0x164   :  { %274 = vrot.lane.b32.xlu1 %v1201_v18, %s1114_s26 }
 0x1c6   :  { %v171_v19 = vpop.permute.xlu1 %170 }
 0x1c7   :  { %276 = vrot.lane.b32.xlu0 %v171_v19, %s1114_s26 }
 0x1ca   :  { %v156_v20 = vpop.permute.xlu0 %155  ;;  %v173_v21 = vpop.permute.xlu1 %172 }
 0x1cb   :  { %923 = vmatprep.subr.msk.mxu1 %vm174_vm1, %v156_v20  ;;  %278 = vrot.lane.b32.xlu1 %v173_v21, %s1114_s26  ;;  %161 = vst.msk [vmem:[#allocation6 + $0x8] sm:$0xff] %vm159_vm2, %v156_v20 }
 0x1cc   :  { %924 = vmatpush3.xpose.msk.msra.mxu1 %vm174_vm1, %v156_v20 }
 0x1ce   :  { %v154_v22 = vpop.permute.xlu0 %153  ;;  %v283_v23 = vpop.permute.xlu1 %282 }
 0x1cf   :  { %925 = vmatprep.subr.msk.mxu1 %vm174_vm1, %v154_v22  ;;  %933 = vmatprep.subr.msk.mxu0 %vm174_vm1, %v283_v23  ;;  %160 = vst.msk [vmem:[#allocation6] sm:$0xff] %vm159_vm2, %v154_v22 }
 0x1d0   :  { %926 = vmatpush3.xpose.msk.msra.mxu1 %vm174_vm1, %v154_v22  ;;  %934 = vmatpush3.xpose.msk.msra.mxu0 %vm174_vm1, %v283_v23 }
 0x1d2   :  { %v273_v24 = vpop.permute.xlu0 %272  ;;  %v281_v25 = vpop.permute.xlu1 %280 }
 0x1d3   :  { %928 = vmatmul.mubr.msk.f32.vlgmr.msra.gmra.mxu1 %vm174_vm1, %v1201_v18  ;;  %935 = vmatprep.subr.msk.mxu0 %vm174_vm1, %v281_v25 }
 0x1d4   :  { %937 = vmatprep.mubr.msk.f32.mxu0 %vm174_vm1, %v273_v24  ;;  %930 = vmatprep.mubr.msk.f32.mxu1 %vm174_vm1, %v171_v19 }
 0x1d5   :  { %936 = vmatpush3.xpose.msk.msra.mxu0 %vm174_vm1, %v281_v25 }
 0x1d6   :  { %v275_v26 = vpop.permute.xlu1 %274 }
 0x1d7   :  { %931 = vmatmul.mubr.msk.f32.gmra.mxu1 %vm174_vm1, %v173_v21 }
 0x1d8   :  { %938 = vmatmul.mubr.msk.f32.vlgmr.msra.gmra.mxu0 %vm174_vm1, %v275_v26 }
 0x239   :  { %v277_v27 = vpop.permute.xlu0 %276 }
 0x23a   :  { %940 = vmatprep.mubr.msk.f32.mxu0 %vm174_vm1, %v277_v27 }
 0x23d   :  { %v279_v28 = vpop.permute.xlu1 %278 }
 0x23e   :  { %941 = vmatmul.mubr.msk.f32.gmra.mxu0 %vm174_vm1, %v279_v28 }
 0x293   :  { %v929_v30 = vpop.f32.mrf.mxu1 }
 0x294   :  { %v390_v31 = vadd.f32 %v929_v30, %v382_v29 }
 0x295   :  { %v253_v32 = vpop.f32.mrf.mxu1 }
 0x296   :  { %v400_v33 = vsel %vm159_vm2, %v390_v31, -inf  ;;  %v389_v42 = vadd.f32 %v381_v37, %v253_v32 }
 0x297   :  { %v932_v35 = vpop.f32.mrf.mxu1  ;;  %401 = vmax.xlane.f32.xlu1 %v400_v33 }
 0x298   :  { %v939_v38 = vpop.f32.mrf.mxu0  ;;  %v397_v48 = vsel %vm159_vm2, %v389_v42, -inf  ;;  %v392_v50 = vadd.f32 %v932_v35, %v384_v49 }
 0x299   :  { %v394_v39 = vadd.f32 %v939_v38, %v386_v34  ;;  %v263_v40 = vpop.f32.mrf.mxu1 }
 0x29a   :  { %v391_v41 = vadd.f32 %v383_v36, %v263_v40  ;;  %v362_v44 = vpop.f32.mrf.mxu0  ;;  %v406_v52 = vsel %vm159_vm2, %v392_v50, -inf }
 0x29b   :  { %v412_v43 = vsel %vm159_vm2, %v394_v39, -inf  ;;  %v393_v47 = vadd.f32 %v385_v45, %v362_v44 }
 0x29c   :  { %413 = vmax.xlane.f32.xlu0 %v412_v43  ;;  %v403_v46 = vsel %vm159_vm2, %v391_v41, -inf }
 0x29d   :  { %404 = vmax.xlane.f32.xlu1 %v403_v46  ;;  %v409_v51 = vsel %vm159_vm2, %v393_v47, -inf }
 0x2a0   :  { %398 = vmax.xlane.f32.xlu0 %v397_v48 }
 0x2a4   :  { %410 = vmax.xlane.f32.xlu0 %v409_v51 }
 0x2a8   :  { %407 = vmax.xlane.f32.xlu0 %v406_v52 }
 0x2fe   :  { %v942_v54 = vpop.f32.mrf.mxu0 }
 0x2ff   :  { %v396_v56 = vadd.f32 %v942_v54, %v388_v53 }
 0x300   :  { %v372_v57 = vpop.f32.mrf.mxu0 }
 0x301   :  { %v395_v58 = vadd.f32 %v387_v55, %v372_v57  ;;  %v418_v59 = vsel %vm159_vm2, %v396_v56, -inf }
 0x302   :  { %419 = vmax.xlane.f32.xlu0 %v418_v59 }
 0x303   :  { %v415_v60 = vsel %vm159_vm2, %v395_v58, -inf }
 0x304   :  { %416 = vmax.xlane.f32.xlu1 %v415_v60 }
 0x315   :  { %164 = vrot.lane.b32.xlu1 %v1201_v18, %s1115_s22 }
 0x320   :  { %v402_v61 = vpop.xlane.xlu1 %401 }
 0x321   :  { %v422_v62 = vsub.f32 %v390_v31, %v402_v61 }
 0x323   :  { %v431_v63 = vmul.f32 1.442695, %v422_v62 }
 0x325   :  { %989 = vpow2.f32 %v431_v63  ;;  %v414_v0 = vpop.xlane.xlu0 %413 }
 0x326   :  { %v426_v1 = vsub.f32 %v394_v39, %v414_v0  ;;  %v405_v3 = vpop.xlane.xlu1 %404 }
 0x327   :  { %v423_v6 = vsub.f32 %v391_v41, %v405_v3  ;;  %v717_v3 = vld [vmem:[%s1345_s5 + $0x8] sm:$0xff] }
 0x328   :  { %v439_v2 = vmul.f32 1.442695, %v426_v1  ;;  %v719_v1 = vld [vmem:[%s1345_s5 + $0x18] sm:$0xff] }
 0x329   :  { %v399_v4 = vpop.xlane.xlu0 %398  ;;  %v433_v10 = vmul.f32 1.442695, %v423_v6 }
 0x32a   :  { %991 = vpow2.f32 %v439_v2  ;;  %v421_v5 = vsub.f32 %v389_v42, %v399_v4  ;;  %v718_v2 = vld [vmem:[%s1345_s5 + $0x10] sm:$0xff] }
 0x32c   :  { %v429_v7 = vmul.f32 1.442695, %v421_v5  ;;  %v716_v5 = vld [vmem:[%s1345_s5] sm:$0xff]  ;;  %s1119_s5 = smov [#allocation6]  }
 0x32d   :  { %v411_v8 = vpop.xlane.xlu0 %410  ;;  %s820_s10 = sshll.u32 %s1119_s5, 4  ;;  %s821_s10 = int_to_ptr.vmem [resolvable:$true] %s820_s10 }
 0x32e   :  { %993 = vpow2.f32 %v429_v7  ;;  %v425_v9 = vsub.f32 %v393_v47, %v411_v8  ;;  %s1041_s11 = scalar_lea.vmem %s821_s10, 256  ;;  %p1046_p6 = scmp.lt.s32.totalorder %s821_s10, %s821_s10 }
 0x32f   :  { %p1042_p5 = scmp.ne.s32.totalorder %s821_s10, %s1041_s11  ;;  %p1047_p7 = scmp.lt.s32.totalorder %s1041_s11, %s1041_s11 }
 0x330   :  { %v437_v11 = vmul.f32 1.442695, %v425_v9 }
 0x331   :  { %v408_v12 = vpop.xlane.xlu0 %407  ;;  %p1048_p8 = por %p1047_p7, %p1046_p6 }
 0x332   :  { %v1262_v13 = vpop.eup %989  ;;  %995 = vpow2.f32 %v437_v11  ;;  %v424_v14 = vsub.f32 %v392_v50, %v408_v12 }
 0x333   :  { %v448_v15 = vsel %vm159_vm2, %v1262_v13, 0.0  ;;  %997 = vpow2.f32 %v433_v10  ;;  %p1049_p9 = pnand %p1048_p8, %p1042_p5 }
 0x334   :  { %v435_v17 = vmul.f32 1.442695, %v424_v14  ;;  %449 = vadd.xlane.f32.xlu0 %v448_v15 }
 0x336   :  { %999 = vpow2.f32 %v435_v17 }
 0x337   :  { %v1266_v19 = vpop.eup %991 }
 0x338   :  { %v460_v20 = vsel %vm159_vm2, %v1266_v19, 0.0 }
 0x339   :  { %461 = vadd.xlane.f32.xlu0 %v460_v20 }
 0x33b   :  { %v994_v21 = vpop.eup %993 }
 0x33c   :  { %v445_v22 = vsel %vm159_vm2, %v994_v21, 0.0 }
 0x33d   :  { %446 = vadd.xlane.f32.xlu1 %v445_v22 }
 0x33f   :  { %v996_v23 = vpop.eup %995 }
 0x340   :  { %v457_v24 = vsel %vm159_vm2, %v996_v23, 0.0  ;;  %v1272_v25 = vpop.eup %997 }
 0x341   :  { %458 = vadd.xlane.f32.xlu1 %v457_v24  ;;  %v451_v28 = vsel %vm159_vm2, %v1272_v25, 0.0 }
 0x343   :  { %v1274_v26 = vpop.eup %999 }
 0x344   :  { %v454_v27 = vsel %vm159_vm2, %v1274_v26, 0.0 }
 0x345   :  { %455 = vadd.xlane.f32.xlu0 %v454_v27  ;;  %452 = vadd.xlane.f32.xlu1 %v451_v28 }
 0x356   :  { %584 = vrot.lane.b32.xlu1 %v1201_v18, %s1116_s4 }
 0x38b   :  { %v420_v29 = vpop.xlane.xlu0 %419 }
 0x38c   :  { %v428_v30 = vsub.f32 %v396_v56, %v420_v29 }
 0x38d   :  { %v417_v31 = vpop.xlane.xlu1 %416 }
 0x38e   :  { %v443_v32 = vmul.f32 1.442695, %v428_v30  ;;  %v427_v33 = vsub.f32 %v395_v58, %v417_v31 }
 0x390   :  { %1001 = vpow2.f32 %v443_v32  ;;  %v441_v34 = vmul.f32 1.442695, %v427_v33 }
 0x391   :  { %v165_v35 = vpop.permute.xlu1 %164 }
 0x392   :  { %1003 = vpow2.f32 %v441_v34  ;;  %169 = vst.msk [vmem:[#allocation8 + $0x8] sm:$0xff] %vm159_vm2, %v165_v35  ;;  %943 = vmatprep.subr.mxu1 %v165_v35 }
 0x393   :  { %944 = vmatpush3.msra.mxu1 %v165_v35 }
 0x39d   :  { %v1002_v36 = vpop.eup %1001 }
 0x39e   :  { %v466_v37 = vsel %vm159_vm2, %v1002_v36, 0.0 }
 0x39f   :  { %v1004_v38 = vpop.eup %1003  ;;  %467 = vadd.xlane.f32.xlu0 %v466_v37 }
 0x3a0   :  { %v463_v18 = vsel %vm159_vm2, %v1004_v38, 0.0 }
 0x3a1   :  { %464 = vadd.xlane.f32.xlu1 %v463_v18 }
 0x3b2   :  { %582 = vrot.lane.b32.xlu1 %v1196_v16, %s1116_s4 }
 0x3b5   :  { %162 = vrot.lane.b32.xlu0 %v1196_v16, %s1115_s22 }
 0x3bd   :  { %v450_v47 = vpop.xlane.xlu0 %449 }
 0x3c2   :  { %v462_v48 = vpop.xlane.xlu0 %461 }
 0x3c6   :  { %v447_v39 = vpop.xlane.xlu1 %446 }
 0x3c7   :  { %1005 = vrcp.f32 %v447_v39 }
 0x3ca   :  { %v459_v40 = vpop.xlane.xlu1 %458 }
 0x3cb   :  { %1007 = vrcp.f32 %v459_v40 }
 0x3cc   :  { %1009 = vrcp.f32 %v450_v47 }
 0x3ce   :  { %v453_v41 = vpop.xlane.xlu1 %452  ;;  %v456_v16 = vpop.xlane.xlu0 %455 }
 0x3cf   :  { %1011 = vrcp.f32 %v453_v41 }
 0x3d0   :  { %1013 = vrcp.f32 %v462_v48 }
 0x3d1   :  { %1015 = vrcp.f32 %v456_v16 }
 0x3d2   :  { %v585_v42 = vpop.permute.xlu1 %584 }
 0x3d3   :  { %953 = vmatprep.subr.mxu0 %v585_v42 }
 0x3d4   :  { %v1006_v43 = vpop.eup %1005  ;;  %954 = vmatpush3.msra.mxu0 %v585_v42 }
 0x3d5   :  { %v477_v44 = vmul.f32 %v1006_v43, %v994_v21 }
 0x3d7   :  { %947 = vmatprep.mubr.msk.f32.mxu1 %vm159_vm2, %v477_v44 }
 0x3d8   :  { %v1008_v45 = vpop.eup %1007 }
 0x3d9   :  { %v481_v46 = vmul.f32 %v1008_v45, %v996_v23  ;;  %v1010_v50 = vpop.eup %1009 }
 0x3da   :  { %v478_v55 = vmul.f32 %v1010_v50, %v1262_v13 }
 0x3db   :  { %957 = vmatprep.mubr.msk.f32.mxu0 %vm159_vm2, %v481_v46 }
 0x3dc   :  { %v1012_v52 = vpop.eup %1011 }
 0x3dd   :  { %v1014_v53 = vpop.eup %1013  ;;  %v479_v58 = vmul.f32 %v1012_v52, %v1272_v25 }
 0x3de   :  { %v1016_v56 = vpop.eup %1015  ;;  %v482_v59 = vmul.f32 %v1014_v53, %v1266_v19 }
 0x3df   :  { %v480_v60 = vmul.f32 %v1016_v56, %v1274_v26 }
 0x428   :  { %v468_v49 = vpop.xlane.xlu0 %467 }
 0x429   :  { %1017 = vrcp.f32 %v468_v49 }
 0x42a   :  { %v465_v51 = vpop.xlane.xlu1 %464 }
 0x42b   :  { %1019 = vrcp.f32 %v465_v51 }
 0x42c   :  { %v163_v54 = vpop.permute.xlu0 %162 }
 0x42d   :  { %168 = vst.msk [vmem:[#allocation8] sm:$0xff] %vm159_vm2, %v163_v54  ;;  %945 = vmatprep.subr.mxu1 %v163_v54 }
 0x42e   :  { %946 = vmatpush3.msra.mxu1 %v163_v54  ;;  %v583_v57 = vpop.permute.xlu1 %582 }
 0x42f   :  { %948 = vmatmul.mubr.msk.f32.vlgmr.msra.gmra.mxu1 %vm159_vm2, %v478_v55  ;;  %955 = vmatprep.subr.mxu0 %v583_v57 }
 0x430   :  { %950 = vmatprep.mubr.msk.f32.mxu1 %vm159_vm2, %v479_v58  ;;  %956 = vmatpush3.msra.mxu0 %v583_v57 }
 0x431   :  { %958 = vmatmul.mubr.msk.f32.vlgmr.msra.gmra.mxu0 %vm159_vm2, %v482_v59  ;;  %963 = vmatprep.subr.mxu1 %v719_v1 }
 0x432   :  { %964 = vmatpush3.msra.mxu1 %v719_v1 }
 0x433   :  { %951 = vmatmul.mubr.msk.f32.gmra.mxu1 %vm159_vm2, %v480_v60  ;;  %965 = vmatprep.subr.mxu1 %v718_v2 }
 0x434   :  { %966 = vmatpush3.msra.mxu1 %v718_v2 }
 0x435   :  { %967 = vmatprep.subr.mxu1 %v717_v3 }
 0x436   :  { %v1018_v61 = vpop.eup %1017  ;;  %968 = vmatpush3.msra.mxu1 %v717_v3 }
 0x437   :  { %v484_v0 = vmul.f32 %v1018_v61, %v1002_v36  ;;  %969 = vmatprep.subr.mxu1 %v716_v5 }
 0x438   :  { %v1020_v62 = vpop.eup %1019  ;;  %970 = vmatpush3.msra.mxu1 %v716_v5 }
 0x439   :  { %v483_v63 = vmul.f32 %v1020_v62, %v1004_v38 }
 0x43b   :  { %960 = vmatprep.mubr.msk.f32.mxu0 %vm159_vm2, %v483_v63 }
 0x43c   :  { %961 = vmatmul.mubr.msk.f32.gmra.mxu0 %vm159_vm2, %v484_v0 }
 0x4ef   :  { %v949_v4 = vpop.f32.mrf.mxu1 }
 0x4f1   :  { %v563_v6 = vpop.f32.mrf.mxu1  ;;  %v959_v7 = vpop.f32.mrf.mxu0 }
 0x4f2   :  { %697 = vrot.lane.b32.xlu1 %v959_v7, %s1117_s28 }
 0x4f3   :  { %v952_v8 = vpop.f32.mrf.mxu1  ;;  %v666_v9 = vpop.f32.mrf.mxu0 }
 0x4f4   :  { %695 = vrot.lane.b32.xlu0 %v666_v9, %s1117_s28 }
 0x4f5   :  { %v573_v10 = vpop.f32.mrf.mxu1 }
 0x4f6   :  { %689 = vrot.lane.b32.xlu1 %v952_v8, %s1109_s9 }
 0x4f8   :  { %687 = vrot.lane.b32.xlu0 %v573_v10, %s1109_s9 }
 0x4fc   :  { %v962_v11 = vpop.f32.mrf.mxu0 }
 0x4fd   :  { %705 = vrot.lane.b32.xlu1 %v962_v11, %s1118_s29 }
 0x4fe   :  { %v676_v12 = vpop.f32.mrf.mxu0 }
 0x4ff   :  { %703 = vrot.lane.b32.xlu0 %v676_v12, %s1118_s29 }
 0x564   :  { %v698_v13 = vpop.permute.xlu1 %697 }
 0x566   :  { %v696_v14 = vpop.permute.xlu0 %695 }
 0x568   :  { %v690_v17 = vpop.permute.xlu1 %689 }
 0x569   :  { %v710_v20 = vsel %vm174_vm1, %v949_v4, %v690_v17 }
 0x56a   :  { %v688_v15 = vpop.permute.xlu0 %687  ;;  %v712_v24 = vsel %vm159_vm2, %v710_v20, %v698_v13 }
 0x56b   :  { %v709_v19 = vsel %vm174_vm1, %v563_v6, %v688_v15 }
 0x56c   :  { %v711_v22 = vsel %vm159_vm2, %v709_v19, %v696_v14 }
 0x56f   :  { %v706_v21 = vpop.permute.xlu1 %705 }
 0x570   :  { %v715_v26 = vsel %vm713_vm3, %v712_v24, %v706_v21 }
 0x571   :  { %v704_v23 = vpop.permute.xlu0 %703 }
 0x572   :  { %v714_v25 = vsel %vm713_vm3, %v711_v22, %v704_v23 }
 0x573   :  { %971 = vmatprep.mubr.msk.f32.mxu1 %vm55_vm0, %v714_v25 }
 0x574   :  { %972 = vmatmul.mubr.msk.f32.vlgmr.msra.gmra.mxu1 %vm55_vm0, %v715_v26 }
 0x575   :  { %1052 = shalt.err (!%p1049_p9)
}
 0x576   :  { %826 = dma.vmem_to_hbm [thread:$0]  %s821_s10, 256, %s1347_s7, [#allocation7], %s1108_s30, %s1108_s30, %s1109_s9  }
 0x577   :  { %s1120_s14 = smov [#allocation8]  }
 0x578   :  { %s832_s15 = sshll.u32 %s1120_s14, 4  ;;  %s833_s15 = int_to_ptr.vmem [resolvable:$true] %s832_s15 }
 0x579   :  { %s1061_s16 = scalar_lea.vmem %s833_s15, 256  ;;  %p1066_p11 = scmp.lt.s32.totalorder %s833_s15, %s833_s15 }
 0x57a   :  { %p1062_p10 = scmp.ne.s32.totalorder %s833_s15, %s1061_s16  ;;  %p1067_p12 = scmp.lt.s32.totalorder %s1061_s16, %s1061_s16 }
 0x57c   :  { %p1068_p13 = por %p1067_p12, %p1066_p11 }
 0x57e   :  { %p1069_p0 = pnand %p1068_p13, %p1062_p10 }
 0x580   :  { %1072 = shalt.err (!%p1069_p0)
}
 0x581   :  { %838 = dma.vmem_to_hbm [thread:$0]  %s833_s15, 256, %s1348_s8, [#allocation7], %s1108_s30, %s1108_s30, %s1109_s9  }
 0x582   :  { %s1121_s19 = smov [#allocation5]  }
 0x583   :  { %s808_s3 = sshll.u32 %s1121_s19, 4  ;;  %s809_s3 = int_to_ptr.vmem [resolvable:$true] %s808_s3 }
 0x584   :  { %s1081_s7 = scalar_lea.vmem %s809_s3, 256  ;;  %p1086_p2 = scmp.lt.s32.totalorder %s809_s3, %s809_s3 }
 0x585   :  { %p1082_p1 = scmp.ne.s32.totalorder %s809_s3, %s1081_s7  ;;  %p1087_p3 = scmp.lt.s32.totalorder %s1081_s7, %s1081_s7 }
 0x587   :  { %p1088_p4 = por %p1087_p3, %p1086_p2 }
 0x589   :  { %p1089_p5 = pnand %p1088_p4, %p1082_p1 }
 0x634   :  { %v973_v27 = vpop.f32.mrf.mxu1 }
 0x635   :  { %802 = vst.msk [vmem:[#allocation5 + $0x8] sm:$0xff] %vm55_vm0, %v973_v27 }
 0x636   :  { %v792_v28 = vpop.f32.mrf.mxu1 }
 0x637   :  { %801 = vst.msk [vmem:[#allocation5] sm:$0xff] %vm55_vm0, %v792_v28 }
 0x638   :  { %1092 = shalt.err (!%p1089_p5)
}
 0x639   :  { %814 = dma.vmem_to_hbm [thread:$0]  %s809_s3, 256, %s1346_s6, [#allocation4], %s1108_s30, %s1108_s30, %s1109_s9  }
 0x63a   :  { %1103 = dma.done.wait [#allocation4], 256  }
 0x63b   :  { %1104 = vsyncadd [#allocation4], 4294967040 }
 0x63c   :  { %1105 = dma.done.wait [#allocation7], 512  }
 0x63d   :  { %1106 = vsyncadd [#allocation7], 4294966784 }
 0x63e   :  { %848 = vsyncpa [#allocation3], 1 }
 0x63f   :  { %849 = vsyncpa [#allocation4], 1 }
 0x640   :  { %850 = vsyncpa [#allocation7], 1 }

</bundles_post_ra>
